<compile_context>
chip_gen: v7x
topology: tpu7x:2x2x1
jax: 0.10.0
libtpu: 0.0.40
codegen_flags: <defaults>
</compile_context>

<pallas_src>
import functools

import jax
import jax.numpy as jnp
from jax.experimental import pallas as pl
from jax.experimental.pallas import tpu as pltpu

_LN_EPS = 1e-5
_SQRT_2_OVER_PI = 0.7978845608028654


@functools.lru_cache(maxsize=None)
def _cfg():
    """Generation-aware tile targets + VMEM limit."""
    vmem_cap = 64 * 1024 * 1024
    try:
        info = pltpu.get_tpu_info()
        vmem_cap = int(getattr(info, "vmem_capacity_bytes", vmem_cap))
    except Exception:
        pass
    if vmem_cap >= 100 * 1024 * 1024:
        # v5e / v6e: 128 MiB VMEM -> large tiles, fewer grid steps / weight re-streams.
        return {"tm": 512, "tn": 1024, "tk": 1024, "tq": 256, "tkv": 512,
                "vmem_limit": 96 * 1024 * 1024}
    # v7x (64 MiB per TC) or unknown -> conservative tiles.
    return {"tm": 256, "tn": 512, "tk": 256, "tq": 256, "tkv": 512,
            "vmem_limit": 48 * 1024 * 1024}


def _pick(dim, target, mult=8):
    """Largest tile <= target that evenly divides `dim` (falls back to full dim)."""
    if dim <= target:
        return dim
    t = target
    while t > mult and dim % t != 0:
        t //= 2
    return t if (t >= mult and dim % t == 0) else dim


# ---------------------------------------------------------------------------
# Elementwise helpers (used *inside* kernels)
# ---------------------------------------------------------------------------
def _layer_norm(x, gamma, beta):
    mean = jnp.mean(x, axis=-1, keepdims=True)
    xc = x - mean
    var = jnp.mean(xc * xc, axis=-1, keepdims=True)
    return xc * jax.lax.rsqrt(var + _LN_EPS) * gamma + beta


def _gelu_tanh(x):
    # tanh-approximate GELU: the transcendental rides in the EUP slot.
    # TODO(synk): PyTorch's default F.gelu is the exact erf form; tanh approx
    # differs by <~1e-3 absolute.
    return 0.5 * x * (1.0 + jnp.tanh(_SQRT_2_OVER_PI * (x + 0.044715 * x * x * x)))


# ---------------------------------------------------------------------------
# Pallas kernels
# ---------------------------------------------------------------------------
def _ln_matmul_kernel(x_ref, g_ref, b_ref, w_ref, o_ref, xn_sc):
    # shared pre-norm fused into the (bias-free) fused-QKV projection; the LN
    # result is cached in VMEM and reused across all output-column tiles.
    @pl.when(pl.program_id(1) == 0)
    def _():
        xn_sc[...] = _layer_norm(x_ref[...].astype(jnp.float32),
                                 g_ref[...], b_ref[...]).astype(xn_sc.dtype)
    o_ref[...] = jnp.dot(xn_sc[...], w_ref[...],
                         preferred_element_type=jnp.float32).astype(o_ref.dtype)


def _ln_geglu_kernel(x_ref, g_ref, b_ref, wa_ref, ba_ref, wg_ref, bg_ref,
                     o_ref, xn_sc):
    # shared pre-norm fused into the GeGLU fc_in (split value/gate weights),
    # LN cached across column tiles.
    @pl.when(pl.program_id(1) == 0)
    def _():
        xn_sc[...] = _layer_norm(x_ref[...].astype(jnp.float32),
                                 g_ref[...], b_ref[...]).astype(xn_sc.dtype)
    xn = xn_sc[...]
    a = jnp.dot(xn, wa_ref[...], preferred_element_type=jnp.float32) + ba_ref[...]
    gt = jnp.dot(xn, wg_ref[...], preferred_element_type=jnp.float32) + bg_ref[...]
    o_ref[...] = (a * _gelu_tanh(gt)).astype(o_ref.dtype)


def _flash_attn_kernel(q_ref, k_ref, v_ref, o_ref, m_sc, l_sc, acc_sc, *,
                       heads, dim_head):
    # flash attention over the (B, N, 3*H*Dh) QKV slab (lane-block index_maps).
    # 1/sqrt(dim_head) is pre-folded into the QKV weights, so no q rescale here.
    ki = pl.program_id(1)

    @pl.when(ki == 0)
    def _():
        m_sc[...] = jnp.full(m_sc.shape, -jnp.inf, m_sc.dtype)
        l_sc[...] = jnp.zeros(l_sc.shape, l_sc.dtype)
        acc_sc[...] = jnp.zeros(acc_sc.shape, acc_sc.dtype)

    q = q_ref[0]                  # (tq, H*Dh), input dtype (bf16) -> bf16 MXU
    k = k_ref[0]
    v = v_ref[0]

    # TODO(synk): for large head counts move heads onto a grid axis instead of
    # this static unroll.
    for h in range(heads):
        sl = slice(h * dim_head, (h + 1) * dim_head)
        s = jax.lax.dot_general(q[:, sl], k[:, sl],
                                (((1,), (1,)), ((), ())),
                                preferred_element_type=jnp.float32)   # (tq, tkv)
        m_prev = m_sc[h]                                              # (tq, 1)
        m_new = jnp.maximum(m_prev, jnp.max(s, axis=-1, keepdims=True))
        alpha = jnp.exp(m_prev - m_new)
        p = jnp.exp(s - m_new)
        l_sc[h] = alpha * l_sc[h] + jnp.sum(p, axis=-1, keepdims=True)
        acc_sc[:, sl] = alpha * acc_sc[:, sl] + jnp.dot(
            p.astype(v.dtype), v[:, sl], preferred_element_type=jnp.float32)
        m_sc[h] = m_new

    @pl.when(ki == pl.num_programs(1) - 1)
    def _():
        tq = acc_sc.shape[0]
        inv = jnp.concatenate(
            [jnp.broadcast_to(pl.reciprocal(l_sc[h], approx=True), (tq, dim_head))
             for h in range(heads)], axis=-1)
        o_ref[0] = (acc_sc[...] * inv).astype(o_ref.dtype)   # single lane-dense store


def _glu_out_kernel(x_ref, wa_ref, wg_ref, ba_ref, bg_ref, r_ref, g_ref, be_ref,
                    o_ref, acc_a, acc_g, *, apply_norm):
    # attention fc_out: Linear -> GLU, fused residual add + optional post-norm.
    k = pl.program_id(1)

    @pl.when(k == 0)
    def _():
        acc_a[...] = jnp.zeros(acc_a.shape, acc_a.dtype)
        acc_g[...] = jnp.zeros(acc_g.shape, acc_g.dtype)

    x = x_ref[...]
    acc_a[...] += jnp.dot(x, wa_ref[...], preferred_element_type=jnp.float32)
    acc_g[...] += jnp.dot(x, wg_ref[...], preferred_element_type=jnp.float32)

    @pl.when(k == pl.num_programs(1) - 1)
    def _():
        y = ((acc_a[...] + ba_ref[...]) * jax.nn.sigmoid(acc_g[...] + bg_ref[...])
             + r_ref[...].astype(jnp.float32))
        if apply_norm:                                  # between-layer shared norm
            y = _layer_norm(y, g_ref[...], be_ref[...])
        o_ref[...] = y.astype(o_ref.dtype)


def _mlp_out_kernel(h_ref, w_ref, b_ref, r_ref, g_ref, be_ref, o_ref, acc, *,
                    apply_norm):
    # MLP fc_out: Linear + bias, fused residual add + optional post-norm.
    k = pl.program_id(1)

    @pl.when(k == 0)
    def _():
        acc[...] = jnp.zeros(acc.shape, acc.dtype)

    acc[...] += jnp.dot(h_ref[...], w_ref[...], preferred_element_type=jnp.float32)

    @pl.when(k == pl.num_programs(1) - 1)
    def _():
        y = acc[...] + b_ref[...] + r_ref[...].astype(jnp.float32)
        if apply_norm:
            y = _layer_norm(y, g_ref[...], be_ref[...])
        o_ref[...] = y.astype(o_ref.dtype)


# ---------------------------------------------------------------------------
# Wrappers (pallas_call plumbing)
# ---------------------------------------------------------------------------
def ln_matmul(x2d, gamma, beta, w):
    M, E = x2d.shape
    C = w.shape[1]
    cfg = _cfg()
    tm = _pick(M, cfg["tm"])
    tn = _pick(C, cfg["tn"], mult=128)
    return pl.pallas_call(
        _ln_matmul_kernel,
        grid=(M // tm, C // tn),
        in_specs=[
            pl.BlockSpec((tm, E), lambda i, c: (i, 0)),
            pl.BlockSpec((1, E), lambda i, c: (0, 0)),
            pl.BlockSpec((1, E), lambda i, c: (0, 0)),
            pl.BlockSpec((E, tn), lambda i, c: (0, c)),
        ],
        out_specs=pl.BlockSpec((tm, tn), lambda i, c: (i, c)),
        out_shape=jax.ShapeDtypeStruct((M, C), w.dtype),
        scratch_shapes=[pltpu.VMEM((tm, E), w.dtype)],          # cached LN(x)
        compiler_params=pltpu.CompilerParams(
            dimension_semantics=("parallel", "arbitrary"),
            vmem_limit_bytes=cfg["vmem_limit"]),
    )(x2d, gamma, beta, w)


def ln_geglu(x2d, gamma, beta, wa, ba, wg, bg):
    M, E = x2d.shape
    Hd = wa.shape[1]
    cfg = _cfg()
    tm = _pick(M, cfg["tm"])
    tn = _pick(Hd, cfg["tn"], mult=128)
    return pl.pallas_call(
        _ln_geglu_kernel,
        grid=(M // tm, Hd // tn),
        in_specs=[
            pl.BlockSpec((tm, E), lambda i, c: (i, 0)),
            pl.BlockSpec((1, E), lambda i, c: (0, 0)),
            pl.BlockSpec((1, E), lambda i, c: (0, 0)),
            pl.BlockSpec((E, tn), lambda i, c: (0, c)),
            pl.BlockSpec((1, tn), lambda i, c: (0, c)),
            pl.BlockSpec((E, tn), lambda i, c: (0, c)),
            pl.BlockSpec((1, tn), lambda i, c: (0, c)),
        ],
        out_specs=pl.BlockSpec((tm, tn), lambda i, c: (i, c)),
        out_shape=jax.ShapeDtypeStruct((M, Hd), wa.dtype),
        scratch_shapes=[pltpu.VMEM((tm, E), wa.dtype)],         # cached LN(x)
        compiler_params=pltpu.CompilerParams(
            dimension_semantics=("parallel", "arbitrary"),
            vmem_limit_bytes=cfg["vmem_limit"]),
    )(x2d, gamma, beta, wa, ba, wg, bg)


def flash_attention(qkv, heads, dim_head):
    # qkv: (B, N, 3*H*Dh) with columns laid out as [q | k | v]; the three
    # in_specs lane-block the SAME array, so no XLA split / head transpose.
    B, N, threeHD = qkv.shape
    hdh = heads * dim_head
    assert threeHD == 3 * hdh
    cfg = _cfg()
    tq = _pick(N, cfg["tq"])
    tkv = _pick(N, cfg["tkv"])
    nq = N // tq
    nkv = N // tkv
    kern = functools.partial(_flash_attn_kernel, heads=heads, dim_head=dim_head)
    # Merge (B, q-tile) into one parallel axis -> better 2-TC load balance on v7x.
    return pl.pallas_call(
        kern,
        grid=(B * nq, nkv),
        in_specs=[
            pl.BlockSpec((1, tq, hdh), lambda bq, ki: (bq // nq, bq % nq, 0)),   # q
            pl.BlockSpec((1, tkv, hdh), lambda bq, ki: (bq // nq, ki, 1)),       # k
            pl.BlockSpec((1, tkv, hdh), lambda bq, ki: (bq // nq, ki, 2)),       # v
        ],
        out_specs=pl.BlockSpec((1, tq, hdh), lambda bq, ki: (bq // nq, bq % nq, 0)),
        out_shape=jax.ShapeDtypeStruct((B, N, hdh), qkv.dtype),
        scratch_shapes=[
            pltpu.VMEM((heads, tq, 1), jnp.float32),    # running max
            pltpu.VMEM((heads, tq, 1), jnp.float32),    # running sum
            pltpu.VMEM((tq, hdh), jnp.float32),         # lane-dense output accumulator
        ],
        compiler_params=pltpu.CompilerParams(
            dimension_semantics=("parallel", "arbitrary"),
            vmem_limit_bytes=cfg["vmem_limit"]),
    )(qkv, qkv, qkv)


def glu_out(x2d, wa, wg, ba, bg, residual, gamma, beta, apply_norm):
    M, K = x2d.shape
    E = wa.shape[1]
    cfg = _cfg()
    tm = _pick(M, cfg["tm"])
    tk = _pick(K, cfg["tk"], mult=128)
    kern = functools.partial(_glu_out_kernel, apply_norm=apply_norm)
    return pl.pallas_call(
        kern,
        grid=(M // tm, K // tk),
        in_specs=[
            pl.BlockSpec((tm, tk), lambda i, k: (i, k)),
            pl.BlockSpec((tk, E), lambda i, k: (k, 0)),
            pl.BlockSpec((tk, E), lambda i, k: (k, 0)),
            pl.BlockSpec((1, E), lambda i, k: (0, 0)),
            pl.BlockSpec((1, E), lambda i, k: (0, 0)),
            pl.BlockSpec((tm, E), lambda i, k: (i, 0)),
            pl.BlockSpec((1, E), lambda i, k: (0, 0)),
            pl.BlockSpec((1, E), lambda i, k: (0, 0)),
        ],
        out_specs=pl.BlockSpec((tm, E), lambda i, k: (i, 0)),
        out_shape=jax.ShapeDtypeStruct((M, E), residual.dtype),
        scratch_shapes=[pltpu.VMEM((tm, E), jnp.float32),
                        pltpu.VMEM((tm, E), jnp.float32)],
        compiler_params=pltpu.CompilerParams(
            dimension_semantics=("parallel", "arbitrary"),
            vmem_limit_bytes=cfg["vmem_limit"]),
    )(x2d, wa, wg, ba, bg, residual, gamma, beta)


def mlp_out(h2d, w, b, residual, gamma, beta, apply_norm):
    M, K = h2d.shape
    E = w.shape[1]
    cfg = _cfg()
    tm = _pick(M, cfg["tm"])
    tk = _pick(K, cfg["tk"], mult=128)
    kern = functools.partial(_mlp_out_kernel, apply_norm=apply_norm)
    return pl.pallas_call(
        kern,
        grid=(M // tm, K // tk),
        in_specs=[
            pl.BlockSpec((tm, tk), lambda i, k: (i, k)),
            pl.BlockSpec((tk, E), lambda i, k: (k, 0)),
            pl.BlockSpec((1, E), lambda i, k: (0, 0)),
            pl.BlockSpec((tm, E), lambda i, k: (i, 0)),
            pl.BlockSpec((1, E), lambda i, k: (0, 0)),
            pl.BlockSpec((1, E), lambda i, k: (0, 0)),
        ],
        out_specs=pl.BlockSpec((tm, E), lambda i, k: (i, 0)),
        out_shape=jax.ShapeDtypeStruct((M, E), residual.dtype),
        scratch_shapes=[pltpu.VMEM((tm, E), jnp.float32)],
        compiler_params=pltpu.CompilerParams(
            dimension_semantics=("parallel", "arbitrary"),
            vmem_limit_bytes=cfg["vmem_limit"]),
    )(h2d, w, b, residual, gamma, beta)


# ---------------------------------------------------------------------------
# Forward pass
# ---------------------------------------------------------------------------
def attention_layers_forward(x, prepared, heads, dim_head):
    """Forward with kernel-ready (prepared) params; residual stream stays in x.dtype."""
    B, N, E = x.shape
    hdh = heads * dim_head
    gamma = prepared["gamma"]
    beta = prepared["beta"]
    layer_types = prepared["layer_types"]
    n_layers = len(layer_types)

    x2 = x.reshape(B * N, E)
    for i, (lt, p) in enumerate(zip(layer_types, prepared["layers"])):
        residual = x2
        post_norm = i != n_layers - 1     # shared norm re-applied after non-last layers
        if lt == "self":
            qkv = ln_matmul(x2, gamma, beta, p["wqkv"])            # pre-norm + fused QKV
            attn = flash_attention(qkv.reshape(B, N, 3 * hdh), heads, dim_head)
            x2 = glu_out(attn.reshape(B * N, hdh), p["wo_a"], p["wo_g"],
                         p["bo_a"], p["bo_g"], residual, gamma, beta, post_norm)
        else:
            h = ln_geglu(x2, gamma, beta, p["w1a"], p["b1a"], p["w1g"], p["b1g"])
            x2 = mlp_out(h, p["w2"], p["b2"], residual, gamma, beta, post_norm)
    return x2.reshape(B, N, E)


# ---------------------------------------------------------------------------
# Parameter init (PyTorch-equivalent, f32) + kernel-ready preparation
# ---------------------------------------------------------------------------
def init_params(key, embed_dim, heads, dim_head, num_layers, exp_factor=4):
    layer_types = ("self", "mlp") * num_layers
    keys = iter(jax.random.split(key, 16 * len(layer_types) + 2))

    def w(shape, scale=0.05):
        return jax.random.normal(next(keys), shape, jnp.float32) * scale

    hidden = embed_dim * exp_factor
    dim_qk = heads * dim_head
    layers = []
    for lt in layer_types:
        if lt == "self":
            layers.append({
                # fused [wq | wk | wv] (bias-free, as in the module)
                "wqkv": jnp.concatenate(
                    [w((embed_dim, dim_qk)), w((embed_dim, dim_qk)),
                     w((embed_dim, dim_qk))], axis=1),
                # fc_out = Linear(dim_v, 2*E) + GLU, pre-split value/gate halves
                "wo_a": w((dim_qk, embed_dim)),
                "wo_g": w((dim_qk, embed_dim)),
                "bo_a": w((embed_dim,), 0.01),
                "bo_g": w((embed_dim,), 0.01),
            })
        else:
            layers.append({
                # GeGLU fc_in, pre-split value/gate halves
                "w1a": w((embed_dim, hidden)),
                "w1g": w((embed_dim, hidden)),
                "b1a": w((hidden,), 0.01),
                "b1g": w((hidden,), 0.01),
                "w2": w((hidden, embed_dim)),
                "b2": w((embed_dim,), 0.01),
            })
    return {
        # Single LayerNorm instance shared by every layer (as in the PyTorch code).
        "gamma": jnp.ones((embed_dim,), jnp.float32),
        "beta": jnp.zeros((embed_dim,), jnp.float32),
        "layers": layers,
        "layer_types": layer_types,
    }


def prepare_params(params, heads, dim_head, compute_dtype=jnp.bfloat16):
    """One-time param prep: fold 1/sqrt(dim_head) into q cols, cast weights to
    the MXU compute dtype (bf16), keep biases / LN affine in f32."""
    E = params["gamma"].shape[0]
    hdh = heads * dim_head
    scale = dim_head ** -0.5
    prepared = {
        "gamma": params["gamma"].reshape(1, E).astype(jnp.float32),
        "beta": params["beta"].reshape(1, E).astype(jnp.float32),
        "layer_types": params["layer_types"],
        "layers": [],
    }
    for lt, p in zip(params["layer_types"], params["layers"]):
        if lt == "self":
            wqkv = jnp.concatenate(
                [p["wqkv"][:, :hdh] * scale, p["wqkv"][:, hdh:]], axis=1)
            prepared["layers"].append({
                "wqkv": wqkv.astype(compute_dtype),
                "wo_a": p["wo_a"].astype(compute_dtype),
                "wo_g": p["wo_g"].astype(compute_dtype),
                "bo_a": p["bo_a"].reshape(1, -1).astype(jnp.float32),
                "bo_g": p["bo_g"].reshape(1, -1).astype(jnp.float32),
            })
        else:
            prepared["layers"].append({
                "w1a": p["w1a"].astype(compute_dtype),
                "w1g": p["w1g"].astype(compute_dtype),
                "b1a": p["b1a"].reshape(1, -1).astype(jnp.float32),
                "b1g": p["b1g"].reshape(1, -1).astype(jnp.float32),
                "w2": p["w2"].astype(compute_dtype),
                "b2": p["b2"].reshape(1, -1).astype(jnp.float32),
            })
    return prepared


# ---------------------------------------------------------------------------
# Pure-JAX reference (mirrors the PyTorch forward) for a sanity check
# ---------------------------------------------------------------------------
def _reference_forward(x, params, heads, dim_head):
    B, N, E = x.shape
    gamma, beta = params["gamma"], params["beta"]

    def ln(t):
        mu = jnp.mean(t, -1, keepdims=True)
        var = jnp.mean((t - mu) ** 2, -1, keepdims=True)
        return (t - mu) / jnp.sqrt(var + _LN_EPS) * gamma + beta

    h = x
    layer_types = params["layer_types"]
    n = len(layer_types)
    for i, (lt, p) in enumerate(zip(layer_types, params["layers"])):
        res = h
        xn = ln(h)
        if lt == "self":
            qkv = xn.reshape(B * N, E) @ p["wqkv"]
            q, k, v = jnp.split(qkv, 3, axis=-1)
            sp = lambda t: t.reshape(B, N, heads, dim_head).transpose(0, 2, 1, 3)
            qh, kh, vh = sp(q), sp(k), sp(v)
            s = jnp.einsum("bhqd,bhkd->bhqk", qh, kh) * (dim_head ** -0.5)
            a = jax.nn.softmax(s, axis=-1)
            o = jnp.einsum("bhqk,bhkd->bhqd", a, vh)
            o = o.transpose(0, 2, 1, 3).reshape(B * N, heads * dim_head)
            out = ((o @ p["wo_a"] + p["bo_a"]) *
                   jax.nn.sigmoid(o @ p["wo_g"] + p["bo_g"])).reshape(B, N, E)
        else:
            xf = xn.reshape(B * N, E)
            a = xf @ p["w1a"] + p["b1a"]
            g = xf @ p["w1g"] + p["b1g"]
            hid = a * jax.nn.gelu(g, approximate=True)
            out = (hid @ p["w2"] + p["b2"]).reshape(B, N, E)
        h = out + res
        if i != n - 1:
            h = ln(h)
    return h


if __name__ == "__main__":
    B, N, E = 2, 8, 32
    heads, dim_head = 2, 64       # dim_head=64 is the module's fixed default
    num_layers = 2

    key = jax.random.PRNGKey(0)
    kx, kp = jax.random.split(key)
    x = jax.random.normal(kx, (B, N, E), jnp.float32)
    params = init_params(kp, E, heads, dim_head, num_layers)
    prepared = prepare_params(params, heads, dim_head, compute_dtype=jnp.bfloat16)

    out = attention_layers_forward(x, prepared, heads=heads, dim_head=dim_head)
    out = jax.block_until_ready(out)

    assert out.shape == (B, N, E)
    assert bool(jnp.all(jnp.isfinite(out)))

    ref = _reference_forward(x, params, heads, dim_head)
    max_err = float(jnp.max(jnp.abs(out - ref)))
    assert max_err < 2e-2, f"mismatch vs reference: {max_err}"
    print("KERNEL_OK")
</pallas_src>

<mosaic_0001>
module attributes {stable_mosaic.version = 11 : i64} {
  func.func @_ln_matmul_kernel(%arg0: i32, %arg1: i32, %arg2: memref<16x32xf32, #tpu.memory_space<vmem>>, %arg3: memref<1x32xf32, #tpu.memory_space<vmem>>, %arg4: memref<1x32xf32, #tpu.memory_space<vmem>>, %arg5: memref<32x384xbf16, #tpu.memory_space<vmem>>, %arg6: memref<16x384xbf16, #tpu.memory_space<vmem>>, %arg7: memref<16x32xbf16, #tpu.memory_space<vmem>>) attributes {dimension_semantics = [#tpu.dimension_semantics<parallel>, #tpu.dimension_semantics<arbitrary>], iteration_bounds = array<i64: 1, 1>, scalar_prefetch = 0 : i64, scratch_operands = 1 : i64, tpu.core_type = #tpu.core_type<tc>, window_params = [{transform_indices = @transform_0, window_bounds = array<i64: 16, 32>}, {pipeline_mode = #tpu.pipeline_mode<synchronous>, transform_indices = @transform_1, window_bounds = array<i64: 1, 32>}, {pipeline_mode = #tpu.pipeline_mode<synchronous>, transform_indices = @transform_2, window_bounds = array<i64: 1, 32>}, {transform_indices = @transform_3, window_bounds = array<i64: 32, 384>}, {transform_indices = @transform_4, window_bounds = array<i64: 16, 384>}]} {
    %c0_i32 = arith.constant 0 : i32
    %0 = arith.cmpi eq, %arg1, %c0_i32 : i32
    %1 = arith.extui %0 : i1 to i32
    %c0_i32_0 = arith.constant 0 : i32
    %2 = arith.cmpi ne, %1, %c0_i32_0 : i32
    scf.if %2 {
      %c0_6 = arith.constant 0 : index
      %c0_7 = arith.constant 0 : index
      %8 = vector.load %arg2[%c0_6, %c0_7] : memref<16x32xf32, #tpu.memory_space<vmem>>, vector<16x32xf32>
      %c0_8 = arith.constant 0 : index
      %c0_9 = arith.constant 0 : index
      %9 = vector.load %arg3[%c0_8, %c0_9] : memref<1x32xf32, #tpu.memory_space<vmem>>, vector<1x32xf32>
      %c0_10 = arith.constant 0 : index
      %c0_11 = arith.constant 0 : index
      %10 = vector.load %arg4[%c0_10, %c0_11] : memref<1x32xf32, #tpu.memory_space<vmem>>, vector<1x32xf32>
      %cst_12 = arith.constant dense<0.000000e+00> : vector<16xf32>
      %11 = vector.multi_reduction <add>, %8, %cst_12 [1] : vector<16x32xf32> to vector<16xf32>
      %12 = vector.shape_cast %11 : vector<16xf32> to vector<16x1xf32>
      %cst_13 = arith.constant 3.200000e+01 : f32
      %13 = vector.broadcast %cst_13 : f32 to vector<16x1xf32>
      %14 = arith.divf %12, %13 : vector<16x1xf32>
      %15 = vector.broadcast %14 : vector<16x1xf32> to vector<16x32xf32>
      %16 = arith.subf %8, %15 : vector<16x32xf32>
      %17 = arith.mulf %16, %16 : vector<16x32xf32>
      %cst_14 = arith.constant dense<0.000000e+00> : vector<16xf32>
      %18 = vector.multi_reduction <add>, %17, %cst_14 [1] : vector<16x32xf32> to vector<16xf32>
      %19 = vector.shape_cast %18 : vector<16xf32> to vector<16x1xf32>
      %cst_15 = arith.constant 3.200000e+01 : f32
      %20 = vector.broadcast %cst_15 : f32 to vector<16x1xf32>
      %21 = arith.divf %19, %20 : vector<16x1xf32>
      %cst_16 = arith.constant 9.99999974E-6 : f32
      %22 = vector.broadcast %cst_16 : f32 to vector<16x1xf32>
      %23 = arith.addf %21, %22 : vector<16x1xf32>
      %24 = math.rsqrt %23 : vector<16x1xf32>
      %25 = vector.broadcast %24 : vector<16x1xf32> to vector<16x32xf32>
      %26 = arith.mulf %16, %25 : vector<16x32xf32>
      %27 = vector.broadcast %9 : vector<1x32xf32> to vector<16x32xf32>
      %28 = arith.mulf %26, %27 : vector<16x32xf32>
      %29 = vector.broadcast %10 : vector<1x32xf32> to vector<16x32xf32>
      %30 = arith.addf %28, %29 : vector<16x32xf32>
      %31 = arith.truncf %30 : vector<16x32xf32> to vector<16x32xbf16>
      %c0_17 = arith.constant 0 : index
      %c0_18 = arith.constant 0 : index
      %32 = vector.load %arg7[%c0_17, %c0_18] : memref<16x32xbf16, #tpu.memory_space<vmem>>, vector<16x32xbf16>
      tpu.vector_store %arg7[%c0_17, %c0_18], %31 {strides = array<i32>} : memref<16x32xbf16, #tpu.memory_space<vmem>>, vector<16x32xbf16>,
    } else {
    }
    %c0 = arith.constant 0 : index
    %c0_1 = arith.constant 0 : index
    %3 = vector.load %arg7[%c0, %c0_1] : memref<16x32xbf16, #tpu.memory_space<vmem>>, vector<16x32xbf16>
    %c0_2 = arith.constant 0 : index
    %c0_3 = arith.constant 0 : index
    %4 = vector.load %arg5[%c0_2, %c0_3] : memref<32x384xbf16, #tpu.memory_space<vmem>>, vector<32x384xbf16>
    %cst = arith.constant dense<0.000000e+00> : vector<16x384xf32>
    %5 = tpu.matmul %3, %4, %cst {dimension_numbers = #tpu.dot_dimension_numbers<[1], [0], [0], [1], [0, 0, 1, 1], [], []>} : vector<16x32xbf16>, vector<32x384xbf16>, vector<16x384xf32> -> vector<16x384xf32>
    %6 = arith.truncf %5 : vector<16x384xf32> to vector<16x384xbf16>
    %c0_4 = arith.constant 0 : index
    %c0_5 = arith.constant 0 : index
    %7 = vector.load %arg6[%c0_4, %c0_5] : memref<16x384xbf16, #tpu.memory_space<vmem>>, vector<16x384xbf16>
    tpu.vector_store %arg6[%c0_4, %c0_5], %6 {strides = array<i32>} : memref<16x384xbf16, #tpu.memory_space<vmem>>, vector<16x384xbf16>,
    return
  }
  func.func @transform_0(%arg0: i32, %arg1: i32) -> (i32, i32) {
    %c0_i32 = arith.constant 0 : i32
    %c0_i32_0 = arith.constant 0 : i32
    return %arg0, %c0_i32 : i32, i32
  }
  func.func @transform_1(%arg0: i32, %arg1: i32) -> (i32, i32) {
    %c0_i32 = arith.constant 0 : i32
    %c0_i32_0 = arith.constant 0 : i32
    %c0_i32_1 = arith.constant 0 : i32
    return %c0_i32, %c0_i32_0 : i32, i32
  }
  func.func @transform_2(%arg0: i32, %arg1: i32) -> (i32, i32) {
    %c0_i32 = arith.constant 0 : i32
    %c0_i32_0 = arith.constant 0 : i32
    %c0_i32_1 = arith.constant 0 : i32
    return %c0_i32, %c0_i32_0 : i32, i32
  }
  func.func @transform_3(%arg0: i32, %arg1: i32) -> (i32, i32) {
    %c0_i32 = arith.constant 0 : i32
    %c0_i32_0 = arith.constant 0 : i32
    return %c0_i32, %arg1 : i32, i32
  }
  func.func @transform_4(%arg0: i32, %arg1: i32) -> (i32, i32) {
    %c0_i32 = arith.constant 0 : i32
    return %arg0, %arg1 : i32, i32
  }
}

</mosaic_0001>

<bundles_post_ra>
// kernel: tpu_custom_call.1
= control target key start
LH: loop header
LB: loop body
LE: loop exit
PB: predicated region body
PF: predicated region fallthrough
CT: control target
= control target key end

     0   :  { %9 = vsyncpa [#allocation4], 0  ;;  %s485_s0 = inlined_call_operand.hbm [shape: f32[16,32], index: 0, kind: input, shape index: {}]   ;;  %s486_s1 = inlined_call_operand.vmem [shape: f32[1,32], index: 1, kind: input, shape index: {}]   ;;  %s487_s2 = inlined_call_operand.vmem [shape: f32[1,32], index: 2, kind: input, shape index: {}]   ;;  %s488_s3 = inlined_call_operand.hbm [shape: bf16[32,384], index: 3, kind: input, shape index: {}]   ;;  %s489_s4 = inlined_call_operand.hbm [shape: bf16[16,384], index: 4, kind: output, shape index: {}]  }
   0x1   :  { %10 = vsyncpa [#allocation7], 0 }
   0x2   :  { %11 = vsyncpa [#allocation5], 0  ;;  %s395_s15 = smov [#allocation3]   ;;  %s323_s19 = scalar_lea.hbm %s485_s0, 256 }
   0x3   :  { %s17_s16 = sshll.u32 %s395_s15, 4  ;;  %p324_p0 = scmp.ne.s32.totalorder %s485_s0, %s323_s19  ;;  %s18_s16 = int_to_ptr.vmem [resolvable:$true] %s17_s16 }
   0x4   :  { %p327_p1 = scmp.lt.u32.totalorder %s323_s19, %s485_s0 }
   0x6   :  { %p329_p2 = pnand %p327_p1, %p324_p0 }
   0x8   :  { %332 = shalt.err (!%p329_p2)
}
   0x9   :  { %s333_s24 = scalar_lea.vmem %s18_s16, 256  ;;  %p338_p4 = scmp.lt.s32.totalorder %s18_s16, %s18_s16 }
   0xa   :  { %p334_p3 = scmp.ne.s32.totalorder %s18_s16, %s333_s24  ;;  %p339_p5 = scmp.lt.s32.totalorder %s333_s24, %s333_s24 }
   0xc   :  { %p340_p6 = por %p339_p5, %p338_p4 }
   0xe   :  { %p341_p7 = pnand %p340_p6, %p334_p3 }
  0x10   :  { %344 = shalt.err (!%p341_p7)
}
  0x11   :  { %s396_s25 = smov 128   ;;  %s397_s26 = smov 8  }
  0x12   :  { %23 = dma.hbm_to_vmem [thread:$0]  %s485_s0, 256, %s18_s16, [#allocation4], %s396_s25, %s396_s25, %s397_s26  }
  0x13   :  { %s398_s29 = smov [#allocation6]   ;;  %s345_s7 = scalar_lea.hbm %s488_s3, 768 }
  0x14   :  { %s33_s30 = sshll.u32 %s398_s29, 4  ;;  %p346_p8 = scmp.ne.s32.totalorder %s488_s3, %s345_s7  ;;  %s34_s30 = int_to_ptr.vmem [resolvable:$true] %s33_s30 }
  0x15   :  { %p349_p9 = scmp.lt.u32.totalorder %s345_s7, %s488_s3 }
  0x17   :  { %p351_p10 = pnand %p349_p9, %p346_p8 }
  0x19   :  { %354 = shalt.err (!%p351_p10)
}
  0x1a   :  { %s355_s12 = scalar_lea.vmem %s34_s30, 768  ;;  %p360_p12 = scmp.lt.s32.totalorder %s34_s30, %s34_s30 }
  0x1b   :  { %p356_p11 = scmp.ne.s32.totalorder %s34_s30, %s355_s12  ;;  %p361_p13 = scmp.lt.s32.totalorder %s355_s12, %s355_s12 }
  0x1d   :  { %p362_p0 = por %p361_p13, %p360_p12 }
  0x1f   :  { %p363_p1 = pnand %p362_p0, %p356_p11 }
  0x21   :  { %366 = shalt.err (!%p363_p1)
}
  0x22   :  { %s399_s0 = smov 192   ;;  %s400_s13 = smov 12  }
  0x23   :  { %39 = dma.hbm_to_vmem [thread:$0]  %s488_s3, 768, %s34_s30, [#allocation7], %s399_s0, %s399_s0, %s400_s13  }
  0x24   :  { %389 = dma.done.wait [#allocation4], 256  }
  0x25   :  { %390 = vsyncadd [#allocation4], 4294967040 }
  0x26   :  { %391 = dma.done.wait [#allocation7], 768  }
  0x27   :  { %392 = vsyncadd [#allocation7], 4294966528  ;;  %vm55_vm0 = vcmask 261120   ;;  %v51_v0 = vld [vmem:[#allocation3] sm:$0xff]  ;;  %v52_v1 = vld [vmem:[#allocation3 + $0x8] sm:$0xff]  ;;  %v401_v17 = vmov 0.0  }
  0x28   :  { %v56_v2 = vsel %vm55_vm0, %v51_v0, 0.0  ;;  %v59_v3 = vsel %vm55_vm0, %v52_v1, 0.0  ;;  %v311_v14 = vld [vmem:[#allocation6 + $0x4] ss:$12 sps:$4 sm:$0xff]   ;;  %v313_v15 = vld [vmem:[#allocation6] ss:$12 sps:$4 sm:$0xff]   ;;  %293 = vmatprep.subr.bf16.mxu1 %v401_v17 }
  0x29   :  { %57 = vadd.xlane.f32.xlu0 %v56_v2  ;;  %v314_v16 = vld [vmem:[#allocation6 + $0x8] ss:$12 sps:$4 sm:$0xff]   ;;  %146 = vmatprep.subr.bf16.mxu0 %v311_v14  ;;  %v317_v19 = vld [vmem:[#allocation6 + $0x18] ss:$12 sps:$4 sm:$0xff]   ;;  %v318_v20 = vld [vmem:[#allocation6 + $0x20] ss:$12 sps:$4 sm:$0xff]  }
  0x2a   :  { %v315_v18 = vld [vmem:[#allocation6 + $0x1c] ss:$12 sps:$4 sm:$0xff]   ;;  %147 = vmatpush1.bf16.msra.mxu0 %v313_v15  ;;  %294 = vmatpush3.bf16.msra.mxu1 %v314_v16  ;;  %v402_v21 = vmov 0   ;;  %vm403_vm1 = vmmov 0  }
  0x2b   :  { %148 = vmatprep.subr.bf16.mxu0 %v315_v18  ;;  %295 = vmatprep.subr.bf16.mxu1 %v401_v17  ;;  %v272_v30 = vld [vmem:[%s486_s1] ss:$0 sm:$0xff]  ;;  %s404_s1 = smov [#allocation8]  }
  0x2c   :  { %178 = vmatprep.mubr.bf16.mxu0 %v402_v21  ;;  %297 = vmatprep.mubr.msk.bf16.mxu1 %vm403_vm1, %v401_v17  ;;  %v273_v34 = vld [vmem:[%s487_s2] ss:$0 sm:$0xff]  ;;  %s259_s19 = sshll.u32 %s404_s1, 4  ;;  %s260_s19 = int_to_ptr.vmem [resolvable:$true] %s259_s19 }
  0x2d   :  { %60 = vadd.xlane.f32.xlu0 %v59_v3  ;;  %s367_s2 = scalar_lea.vmem %s260_s19, 384  ;;  %p372_p3 = scmp.lt.s32.totalorder %s260_s19, %s260_s19 }
  0x2e   :  { %149 = vmatpush1.bf16.msra.mxu0 %v317_v19  ;;  %296 = vmatpush3.bf16.msra.mxu1 %v318_v20  ;;  %p368_p2 = scmp.ne.s32.totalorder %s260_s19, %s367_s2  ;;  %p373_p4 = scmp.lt.s32.totalorder %s367_s2, %s367_s2 }
  0x30   :  { %p374_p5 = por %p373_p4, %p372_p3 }
  0x32   :  { %p375_p6 = pnand %p374_p5, %p368_p2 }
  0xb6   :  { %v58_v4 = vpop.xlane.xlu0 %57 }
  0xb7   :  { %v63_v5 = vmul.f32 0.03125, %v58_v4 }
  0xb9   :  { %v65_v6 = vsub.f32 %v51_v0, %v63_v5 }
  0xba   :  { %v61_v7 = vpop.xlane.xlu0 %60 }
  0xbb   :  { %v64_v8 = vmul.f32 0.03125, %v61_v7  ;;  %v67_v9 = vmul.f32 %v65_v6, %v65_v6 }
  0xbd   :  { %v66_v10 = vsub.f32 %v52_v1, %v64_v8  ;;  %v69_v11 = vsel %vm55_vm0, %v67_v9, 0.0 }
  0xbe   :  { %70 = vadd.xlane.f32.xlu1 %v69_v11 }
  0xbf   :  { %v68_v12 = vmul.f32 %v66_v10, %v66_v10 }
  0xc1   :  { %v72_v13 = vsel %vm55_vm0, %v68_v12, 0.0 }
  0xc2   :  { %73 = vadd.xlane.f32.xlu1 %v72_v13 }
 0x14b   :  { %v71_v22 = vpop.xlane.xlu1 %70 }
 0x14c   :  { %v75_v23 = vmul.f32 0.03125, %v71_v22 }
 0x14e   :  { %v77_v24 = vadd.f32 1e-05, %v75_v23 }
 0x14f   :  { %v74_v25 = vpop.xlane.xlu1 %73 }
 0x150   :  { %319 = vrsqrt.f32 %v77_v24  ;;  %v76_v26 = vmul.f32 0.03125, %v74_v25 }
 0x152   :  { %v78_v27 = vadd.f32 1e-05, %v76_v26 }
 0x154   :  { %321 = vrsqrt.f32 %v78_v27 }
 0x15a   :  { %v320_v28 = vpop.eup %319 }
 0x15b   :  { %v81_v29 = vmul.f32 %v320_v28, %v65_v6 }
 0x15d   :  { %v89_v32 = vmul.f32 %v272_v30, %v81_v29 }
 0x15e   :  { %v322_v31 = vpop.eup %321 }
 0x15f   :  { %v82_v33 = vmul.f32 %v322_v31, %v66_v10  ;;  %v97_v36 = vadd.f32 %v273_v34, %v89_v32 }
 0x161   :  { %v90_v35 = vmul.f32 %v272_v30, %v82_v33 }
 0x163   :  { %v98_v37 = vadd.f32 %v273_v34, %v90_v35 }
 0x165   :  { %v99_v38 = vpack.c.bf16 %v98_v37, %v97_v36 }
 0x167   :  { %100 = vst.msk [vmem:[#allocation2] sm:$0xff] %vm55_vm0, %v99_v38 }
 0x16e   :  { %v101_v39 = vld [vmem:[#allocation2] sm:$0xff] }
 0x16f   :  { %280 = vmatmul.mubr.msk.bf16.vlgmr.msra.gmra.mrb[0].mxu0 %vm55_vm0, %v101_v39  ;;  %298 = vmatmul.mubr.msk.bf16.vlgmr.msra.gmra.mrb[0].mxu1 %vm55_vm0, %v101_v39 }
 0x242   :  { %v180_v40 = vpop.f32.mrb[0].mxu0  ;;  %v223_v41 = vpop.f32.mrb[0].mxu1 }
 0x243   :  { %v287_v42 = vpack.c.bf16 %v223_v41, %v223_v41  ;;  %v182_v43 = vpop.f32.mrb[1].mxu0  ;;  %v299_v44 = vpop.f32.mrb[1].mxu1 }
 0x244   :  { %v286_v45 = vpack.c.bf16 %v182_v43, %v180_v40  ;;  %v184_v46 = vpop.f32.mrb[2].mxu0  ;;  %v226_v47 = vpop.f32.mrb[2].mxu1 }
 0x245   :  { %251 = vst [vmem:[#allocation8 + $0x8] sm:$0xf] %v287_v42  ;;  %v289_v48 = vpack.c.bf16 %v226_v47, %v226_v47  ;;  %v186_v49 = vpop.f32.mrb[3].mxu0  ;;  %v300_v50 = vpop.f32.mrb[3].mxu1 }
 0x246   :  { %250 = vst [vmem:[#allocation8] sm:$0xff] %v286_v45  ;;  %v288_v51 = vpack.c.bf16 %v186_v49, %v184_v46 }
 0x247   :  { %253 = vst [vmem:[#allocation8 + $0x14] sm:$0xf] %v289_v48 }
 0x248   :  { %252 = vst [vmem:[#allocation8 + $0xc] sm:$0xff] %v288_v51 }
 0x249   :  { %378 = shalt.err (!%p375_p6)
}
 0x24a   :  { %s379_s22 = scalar_lea.hbm %s489_s4, 384 }
 0x24b   :  { %p380_p7 = scmp.ne.s32.totalorder %s489_s4, %s379_s22  ;;  %p383_p8 = scmp.lt.u32.totalorder %s379_s22, %s489_s4 }
 0x24d   :  { %p385_p9 = pnand %p383_p8, %p380_p7 }
 0x24f   :  { %388 = shalt.err (!%p385_p9)
}
 0x250   :  { %265 = dma.vmem_to_hbm [thread:$0]  %s260_s19, 384, %s489_s4, [#allocation5], %s399_s0, %s399_s0, %s400_s13  }
 0x251   :  { %393 = dma.done.wait [#allocation5], 384  }
 0x252   :  { %394 = vsyncadd [#allocation5], 4294966912 }
 0x253   :  { %269 = vsyncpa [#allocation4], 1 }
 0x254   :  { %270 = vsyncpa [#allocation7], 1 }
 0x255   :  { %271 = vsyncpa [#allocation5], 1 }

</bundles_post_ra>
